<compile_context>
chip_gen: v7x
topology: tpu7x:2x2x1
jax: 0.10.0
libtpu: 0.0.40
codegen_flags: <defaults>
</compile_context>

<pallas_src>
import jax
import jax.numpy as jnp
from jax import lax
from jax.experimental import pallas as pl
from jax.experimental.pallas import tpu as pltpu


def _temporal_linkage_kernel(w_row_ref, w_col_ref, r_ref, tlm_ref, prec_ref,
                             fwd_ref, bwd_ref, tlm_out_ref, prec_out_ref):
    # Per-grid-step block shapes (Bb batch rows per step):
    #   w_row_ref : (Bb, 1, N)
    #   w_col_ref : (Bb, N, 1)   same values, pre-shaped in the wrapper (free reshape)
    #   r_ref     : (Bb, H, N)
    #   tlm_ref   : (Bb, N, N)
    #   prec_ref  : (Bb, 1, N)
    f32 = jnp.float32
    w_row = w_row_ref[...].astype(f32)    # [Bb, 1, N]
    w_col = w_col_ref[...].astype(f32)    # [Bb, N, 1]
    r = r_ref[...].astype(f32)            # [Bb, H, N]
    tlm = tlm_ref[...].astype(f32)        # [Bb, N, N]
    prec = prec_ref[...].astype(f32)      # [Bb, 1, N]

    bb, n, _ = tlm.shape

    # Off-diagonal predicate, fused into the select (no float mask multiply).
    row = lax.broadcasted_iota(jnp.int32, (bb, n, n), 1)
    col = lax.broadcasted_iota(jnp.int32, (bb, n, n), 2)
    off_diag = row != col

    # --- _update_links (uses OLD precedence) ---
    tlm_new = jnp.where(off_diag,
                        (1.0 - w_col - w_row) * tlm + w_col * prec,
                        0.0)                                        # [Bb, N, N]

    # --- _update_precedence (per batch row) ---
    prec_new = (1.0 - jnp.sum(w_row, axis=-1, keepdims=True)) * prec + w_row

    # --- forward / backward read distributions ---
    # fwd[b,h,i] = sum_j L[b,i,j] * r[b,h,j]; computed as (L @ r^T)^T so only a
    # small [N,H] tile is transposed, never the [N,N] link matrix.
    fwd_nh = lax.dot_general(tlm_new, r, (((2,), (2,)), ((0,), (0,))),
                             preferred_element_type=f32)            # [Bb, N, H]
    fwd = jnp.swapaxes(fwd_nh, -1, -2)                              # [Bb, H, N]
    # bwd[b,h,j] = sum_i r[b,h,i] * L[b,i,j]  (natural MXU layouts, no transpose)
    bwd = lax.dot_general(r, tlm_new, (((2,), (1,)), ((0,), (0,))),
                          preferred_element_type=f32)               # [Bb, H, N]

    fwd_ref[...] = fwd.astype(fwd_ref.dtype)
    bwd_ref[...] = bwd.astype(bwd_ref.dtype)
    tlm_out_ref[...] = tlm_new.astype(tlm_out_ref.dtype)
    prec_out_ref[...] = prec_new.astype(prec_out_ref.dtype)


def _choose_block_b(batch, n, itemsize, budget_bytes=1 << 20):
    """Largest batch block whose [Bb,N,N] link tile is ~<=1 MiB; prefer grid>=2."""
    per_batch = max(n * n * itemsize, 1)
    max_bb = max(1, budget_bytes // per_batch)
    bb = 1
    for cand in range(min(batch, max_bb), 0, -1):
        if batch % cand == 0:
            bb = cand
            break
    # Prefer at least 2 grid steps so both v7x TensorCores get work.
    if batch >= 2 and batch // bb < 2:
        for cand in range(bb - 1, 0, -1):
            if batch % cand == 0 and batch // cand >= 2:
                bb = cand
                break
    return bb


@jax.jit
def temporal_memory_linkage_step(w_dist, prev_r_dists, temp_link_mat, precedence):
    """One forward() call of TemporalMemoryLinkage.

    Args:
      w_dist:        [B, N]
      prev_r_dists:  [B, H, N]
      temp_link_mat: [B, N, N]  (previous state; zeros for a new sequence)
      precedence:    [B, N]     (previous state; zeros for a new sequence)

    Returns:
      (forward_dist [B,H,N], backward_dist [B,H,N],
       new_temp_link_mat [B,N,N], new_precedence [B,N])
    """
    B, N = w_dist.shape
    H = prev_r_dists.shape[1]

    # Free (metadata-only) reshapes; no dtype casts in the wrapper.
    w_row = w_dist.reshape(B, 1, N)
    w_col = w_dist.reshape(B, N, 1)
    p3 = precedence.reshape(B, 1, N)

    out_dt = prev_r_dists.dtype
    state_dt = temp_link_mat.dtype
    prec_dt = precedence.dtype
    tlm_isz = jnp.dtype(state_dt).itemsize

    Bb = _choose_block_b(B, N, tlm_isz)
    grid = (B // Bb,)

    out_shape = (
        jax.ShapeDtypeStruct((B, H, N), out_dt),    # forward_dist
        jax.ShapeDtypeStruct((B, H, N), out_dt),    # backward_dist
        jax.ShapeDtypeStruct((B, N, N), state_dt),  # new temp_link_mat (aliased)
        jax.ShapeDtypeStruct((B, 1, N), prec_dt),   # new precedence (aliased)
    )

    in_specs = [
        pl.BlockSpec((Bb, 1, N), lambda b: (b, 0, 0)),   # w_row
        pl.BlockSpec((Bb, N, 1), lambda b: (b, 0, 0)),   # w_col
        pl.BlockSpec((Bb, H, N), lambda b: (b, 0, 0)),   # prev_r_dists
        pl.BlockSpec((Bb, N, N), lambda b: (b, 0, 0)),   # temp_link_mat
        pl.BlockSpec((Bb, 1, N), lambda b: (b, 0, 0)),   # precedence
    ]
    out_specs = (
        pl.BlockSpec((Bb, H, N), lambda b: (b, 0, 0)),
        pl.BlockSpec((Bb, H, N), lambda b: (b, 0, 0)),
        pl.BlockSpec((Bb, N, N), lambda b: (b, 0, 0)),
        pl.BlockSpec((Bb, 1, N), lambda b: (b, 0, 0)),
    )

    # VMEM sizing: double-buffered blocks + f32 compute temporaries.
    def _isz(x):
        return jnp.dtype(x.dtype).itemsize

    blk_bytes = (Bb * N * _isz(w_dist) * 2
                 + Bb * H * N * _isz(prev_r_dists)
                 + Bb * N * N * tlm_isz * 2
                 + Bb * N * _isz(precedence) * 2
                 + Bb * H * N * jnp.dtype(out_dt).itemsize * 2)
    est_vmem = 2 * blk_bytes + 4 * Bb * N * N * 4
    vmem_limit = int(min(est_vmem + (8 << 20), 100 << 20)) if est_vmem > (14 << 20) else None
    # TODO(synk): for very large N (> ~1400 on v7x's 64 MiB VMEM) add a row-tile
    # grid axis over the [N, N] link matrix instead of only raising the VMEM limit.

    cost = pl.CostEstimate(
        flops=int(B * N * N * (5 + 4 * H)),
        transcendentals=0,
        bytes_accessed=int(2 * B * N * N * tlm_isz
                           + 3 * B * H * N * jnp.dtype(out_dt).itemsize
                           + 4 * B * N * 4),
    )

    fwd, bwd, tlm_new, prec_new = pl.pallas_call(
        _temporal_linkage_kernel,
        grid_spec=pltpu.PrefetchScalarGridSpec(
            num_scalar_prefetch=0,
            grid=grid,
            in_specs=in_specs,
            out_specs=out_specs,
        ),
        out_shape=out_shape,
        input_output_aliases={3: 2, 4: 3},   # tlm and precedence updated in place
        compiler_params=pltpu.CompilerParams(
            dimension_semantics=("parallel",),
            vmem_limit_bytes=vmem_limit,
        ),
        cost_estimate=cost,
    )(w_row, w_col, prev_r_dists, temp_link_mat, p3)

    return fwd, bwd, tlm_new, prec_new.reshape(B, N)


def _reference_step(w_dist, prev_r_dists, temp_link_mat, precedence):
    """Pure-JAX mirror of the PyTorch forward (for verification)."""
    N = w_dist.shape[-1]
    diag_mask = 1.0 - jnp.eye(N, dtype=jnp.float32)[None]
    wt_i = w_dist[..., :, None]
    wt_j = w_dist[..., None, :]
    pt_j = precedence[..., None, :]
    tlm_new = ((1.0 - wt_i - wt_j) * temp_link_mat + wt_i * pt_j) * diag_mask
    prec_new = (1.0 - w_dist.sum(-1, keepdims=True)) * precedence + w_dist
    tlm_mh = tlm_new[:, None]                                   # [B,1,N,N]
    fwd = (tlm_mh * prev_r_dists[:, :, None, :]).sum(-1)        # [B,H,N]
    bwd = (tlm_mh * prev_r_dists[:, :, :, None]).sum(-2)        # [B,H,N]
    return fwd, bwd, tlm_new, prec_new


if __name__ == "__main__":
    B, H, N = 2, 4, 16

    key = jax.random.PRNGKey(0)
    k1, k2, k3, k4 = jax.random.split(key, 4)

    # Distribution-like inputs (as a DNC would produce).
    w_dist_0 = jax.nn.softmax(jax.random.normal(k1, (B, N), jnp.float32), axis=-1)
    r_dists_0 = jax.nn.softmax(jax.random.normal(k2, (B, H, N), jnp.float32), axis=-1)
    w_dist_1 = jax.nn.softmax(jax.random.normal(k3, (B, N), jnp.float32), axis=-1)
    r_dists_1 = jax.nn.softmax(jax.random.normal(k4, (B, H, N), jnp.float32), axis=-1)

    # new_sequence(): state starts at zero (exactly like _init_link).
    tlm = jnp.zeros((B, N, N), jnp.float32)
    prec = jnp.zeros((B, N), jnp.float32)

    # Step 1 (zero state -> zero outputs, matches PyTorch first call).
    fwd1, bwd1, tlm, prec = temporal_memory_linkage_step(w_dist_0, r_dists_0, tlm, prec)
    # Step 2 (non-trivial outputs).
    fwd2, bwd2, tlm, prec = temporal_memory_linkage_step(w_dist_1, r_dists_1, tlm, prec)
    jax.block_until_ready((fwd2, bwd2, tlm, prec))

    # Verify against the pure-JAX reference over the same two steps.
    r_tlm = jnp.zeros((B, N, N), jnp.float32)
    r_prec = jnp.zeros((B, N), jnp.float32)
    rf1, rb1, r_tlm, r_prec = _reference_step(w_dist_0, r_dists_0, r_tlm, r_prec)
    rf2, rb2, r_tlm, r_prec = _reference_step(w_dist_1, r_dists_1, r_tlm, r_prec)

    assert jnp.allclose(fwd1, rf1, atol=1e-5), "forward_dist step1 mismatch"
    assert jnp.allclose(bwd1, rb1, atol=1e-5), "backward_dist step1 mismatch"
    assert jnp.allclose(fwd2, rf2, atol=1e-5), "forward_dist step2 mismatch"
    assert jnp.allclose(bwd2, rb2, atol=1e-5), "backward_dist step2 mismatch"
    assert jnp.allclose(tlm, r_tlm, atol=1e-5), "temp_link_mat mismatch"
    assert jnp.allclose(prec, r_prec, atol=1e-5), "precedence mismatch"

    print("KERNEL_OK")
</pallas_src>

<mosaic_0001>
module attributes {stable_mosaic.version = 11 : i64} {
  func.func @_temporal_linkage_kernel(%arg0: i32, %arg1: memref<1x1x16xf32, #tpu.memory_space<vmem>>, %arg2: memref<1x16x1xf32, #tpu.memory_space<vmem>>, %arg3: memref<1x4x16xf32, #tpu.memory_space<vmem>>, %arg4: memref<1x16x16xf32, #tpu.memory_space<vmem>>, %arg5: memref<1x1x16xf32, #tpu.memory_space<vmem>>, %arg6: memref<1x4x16xf32, #tpu.memory_space<vmem>>, %arg7: memref<1x4x16xf32, #tpu.memory_space<vmem>>, %arg8: memref<1x16x16xf32, #tpu.memory_space<vmem>>, %arg9: memref<1x1x16xf32, #tpu.memory_space<vmem>>) attributes {dimension_semantics = [#tpu.dimension_semantics<parallel>], iteration_bounds = array<i64: 2>, scalar_prefetch = 0 : i64, scratch_operands = 0 : i64, tpu.core_type = #tpu.core_type<tc>, window_params = [{transform_indices = @transform_0, window_bounds = array<i64: 1, 1, 16>}, {transform_indices = @transform_1, window_bounds = array<i64: 1, 16, 1>}, {transform_indices = @transform_2, window_bounds = array<i64: 1, 4, 16>}, {transform_indices = @transform_3, window_bounds = array<i64: 1, 16, 16>}, {transform_indices = @transform_4, window_bounds = array<i64: 1, 1, 16>}, {transform_indices = @transform_5, window_bounds = array<i64: 1, 4, 16>}, {transform_indices = @transform_6, window_bounds = array<i64: 1, 4, 16>}, {transform_indices = @transform_7, window_bounds = array<i64: 1, 16, 16>}, {transform_indices = @transform_8, window_bounds = array<i64: 1, 1, 16>}]} {
    %c0 = arith.constant 0 : index
    %c0_0 = arith.constant 0 : index
    %c0_1 = arith.constant 0 : index
    %0 = vector.load %arg1[%c0, %c0_0, %c0_1] : memref<1x1x16xf32, #tpu.memory_space<vmem>>, vector<1x1x16xf32>
    %c0_2 = arith.constant 0 : index
    %c0_3 = arith.constant 0 : index
    %c0_4 = arith.constant 0 : index
    %1 = vector.load %arg2[%c0_2, %c0_3, %c0_4] : memref<1x16x1xf32, #tpu.memory_space<vmem>>, vector<1x16x1xf32>
    %c0_5 = arith.constant 0 : index
    %c0_6 = arith.constant 0 : index
    %c0_7 = arith.constant 0 : index
    %2 = vector.load %arg3[%c0_5, %c0_6, %c0_7] : memref<1x4x16xf32, #tpu.memory_space<vmem>>, vector<1x4x16xf32>
    %c0_8 = arith.constant 0 : index
    %c0_9 = arith.constant 0 : index
    %c0_10 = arith.constant 0 : index
    %3 = vector.load %arg4[%c0_8, %c0_9, %c0_10] : memref<1x16x16xf32, #tpu.memory_space<vmem>>, vector<1x16x16xf32>
    %c0_11 = arith.constant 0 : index
    %c0_12 = arith.constant 0 : index
    %c0_13 = arith.constant 0 : index
    %4 = vector.load %arg5[%c0_11, %c0_12, %c0_13] : memref<1x1x16xf32, #tpu.memory_space<vmem>>, vector<1x1x16xf32>
    %5 = tpu.iota {dimensions = array<i32: 1>} : vector<1x16x16xi32>
    %6 = tpu.iota {dimensions = array<i32: 2>} : vector<1x16x16xi32>
    %7 = arith.cmpi ne, %5, %6 : vector<1x16x16xi32>
    %cst = arith.constant 1.000000e+00 : f32
    %8 = vector.broadcast %cst : f32 to vector<1x16x1xf32>
    %9 = arith.subf %8, %1 : vector<1x16x1xf32>
    %10 = vector.broadcast %9 : vector<1x16x1xf32> to vector<1x16x16xf32>
    %11 = vector.broadcast %0 : vector<1x1x16xf32> to vector<1x16x16xf32>
    %12 = arith.subf %10, %11 : vector<1x16x16xf32>
    %13 = arith.mulf %12, %3 : vector<1x16x16xf32>
    %14 = vector.broadcast %1 : vector<1x16x1xf32> to vector<1x16x16xf32>
    %15 = vector.broadcast %4 : vector<1x1x16xf32> to vector<1x16x16xf32>
    %16 = arith.mulf %14, %15 : vector<1x16x16xf32>
    %17 = arith.addf %13, %16 : vector<1x16x16xf32>
    %cst_14 = arith.constant 0.000000e+00 : f32
    %18 = vector.broadcast %cst_14 : f32 to vector<1x16x16xf32>
    %19 = arith.select %7, %17, %18 : vector<1x16x16xi1>, vector<1x16x16xf32>
    %cst_15 = arith.constant dense<0.000000e+00> : vector<1x1xf32>
    %20 = vector.multi_reduction <add>, %0, %cst_15 [2] : vector<1x1x16xf32> to vector<1x1xf32>
    %21 = vector.shape_cast %20 : vector<1x1xf32> to vector<1x1x1xf32>
    %cst_16 = arith.constant 1.000000e+00 : f32
    %22 = vector.broadcast %cst_16 : f32 to vector<1x1x1xf32>
    %23 = arith.subf %22, %21 : vector<1x1x1xf32>
    %24 = vector.broadcast %23 : vector<1x1x1xf32> to vector<1x1x16xf32>
    %25 = arith.mulf %24, %4 : vector<1x1x16xf32>
    %26 = arith.addf %25, %0 : vector<1x1x16xf32>
    %cst_17 = arith.constant dense<0.000000e+00> : vector<1x16x4xf32>
    %27 = tpu.matmul %19, %2, %cst_17 {dimension_numbers = #tpu.dot_dimension_numbers<[2], [2], [1], [1], [0, 0, 0, 1, 1, 1], [0], [0]>} : vector<1x16x16xf32>, vector<1x4x16xf32>, vector<1x16x4xf32> -> vector<1x16x4xf32>
    %28 = tpu.transpose %27, [0, 2, 1] : vector<1x16x4xf32> -> vector<1x4x16xf32>
    %cst_18 = arith.constant dense<0.000000e+00> : vector<1x4x16xf32>
    %29 = tpu.matmul %2, %19, %cst_18 {dimension_numbers = #tpu.dot_dimension_numbers<[2], [1], [1], [2], [0, 0, 0, 1, 1, 2], [0], [0]>} : vector<1x4x16xf32>, vector<1x16x16xf32>, vector<1x4x16xf32> -> vector<1x4x16xf32>
    %c0_19 = arith.constant 0 : index
    %c0_20 = arith.constant 0 : index
    %c0_21 = arith.constant 0 : index
    %30 = vector.load %arg6[%c0_19, %c0_20, %c0_21] : memref<1x4x16xf32, #tpu.memory_space<vmem>>, vector<1x4x16xf32>
    tpu.vector_store %arg6[%c0_19, %c0_20, %c0_21], %28 {strides = array<i32>} : memref<1x4x16xf32, #tpu.memory_space<vmem>>, vector<1x4x16xf32>,
    %c0_22 = arith.constant 0 : index
    %c0_23 = arith.constant 0 : index
    %c0_24 = arith.constant 0 : index
    %31 = vector.load %arg7[%c0_22, %c0_23, %c0_24] : memref<1x4x16xf32, #tpu.memory_space<vmem>>, vector<1x4x16xf32>
    tpu.vector_store %arg7[%c0_22, %c0_23, %c0_24], %29 {strides = array<i32>} : memref<1x4x16xf32, #tpu.memory_space<vmem>>, vector<1x4x16xf32>,
    %c0_25 = arith.constant 0 : index
    %c0_26 = arith.constant 0 : index
    %c0_27 = arith.constant 0 : index
    %32 = vector.load %arg8[%c0_25, %c0_26, %c0_27] : memref<1x16x16xf32, #tpu.memory_space<vmem>>, vector<1x16x16xf32>
    tpu.vector_store %arg8[%c0_25, %c0_26, %c0_27], %19 {strides = array<i32>} : memref<1x16x16xf32, #tpu.memory_space<vmem>>, vector<1x16x16xf32>,
    %c0_28 = arith.constant 0 : index
    %c0_29 = arith.constant 0 : index
    %c0_30 = arith.constant 0 : index
    %33 = vector.load %arg9[%c0_28, %c0_29, %c0_30] : memref<1x1x16xf32, #tpu.memory_space<vmem>>, vector<1x1x16xf32>
    tpu.vector_store %arg9[%c0_28, %c0_29, %c0_30], %26 {strides = array<i32>} : memref<1x1x16xf32, #tpu.memory_space<vmem>>, vector<1x1x16xf32>,
    return
  }
  func.func @transform_0(%arg0: i32) -> (i32, i32, i32) {
    %c0_i32 = arith.constant 0 : i32
    %c0_i32_0 = arith.constant 0 : i32
    %c0_i32_1 = arith.constant 0 : i32
    return %arg0, %c0_i32, %c0_i32_0 : i32, i32, i32
  }
  func.func @transform_1(%arg0: i32) -> (i32, i32, i32) {
    %c0_i32 = arith.constant 0 : i32
    %c0_i32_0 = arith.constant 0 : i32
    %c0_i32_1 = arith.constant 0 : i32
    return %arg0, %c0_i32, %c0_i32_0 : i32, i32, i32
  }
  func.func @transform_2(%arg0: i32) -> (i32, i32, i32) {
    %c0_i32 = arith.constant 0 : i32
    %c0_i32_0 = arith.constant 0 : i32
    %c0_i32_1 = arith.constant 0 : i32
    return %arg0, %c0_i32, %c0_i32_0 : i32, i32, i32
  }
  func.func @transform_3(%arg0: i32) -> (i32, i32, i32) {
    %c0_i32 = arith.constant 0 : i32
    %c0_i32_0 = arith.constant 0 : i32
    %c0_i32_1 = arith.constant 0 : i32
    return %arg0, %c0_i32, %c0_i32_0 : i32, i32, i32
  }
  func.func @transform_4(%arg0: i32) -> (i32, i32, i32) {
    %c0_i32 = arith.constant 0 : i32
    %c0_i32_0 = arith.constant 0 : i32
    %c0_i32_1 = arith.constant 0 : i32
    return %arg0, %c0_i32, %c0_i32_0 : i32, i32, i32
  }
  func.func @transform_5(%arg0: i32) -> (i32, i32, i32) {
    %c0_i32 = arith.constant 0 : i32
    %c0_i32_0 = arith.constant 0 : i32
    %c0_i32_1 = arith.constant 0 : i32
    return %arg0, %c0_i32, %c0_i32_0 : i32, i32, i32
  }
  func.func @transform_6(%arg0: i32) -> (i32, i32, i32) {
    %c0_i32 = arith.constant 0 : i32
    %c0_i32_0 = arith.constant 0 : i32
    %c0_i32_1 = arith.constant 0 : i32
    return %arg0, %c0_i32, %c0_i32_0 : i32, i32, i32
  }
  func.func @transform_7(%arg0: i32) -> (i32, i32, i32) {
    %c0_i32 = arith.constant 0 : i32
    %c0_i32_0 = arith.constant 0 : i32
    %c0_i32_1 = arith.constant 0 : i32
    return %arg0, %c0_i32, %c0_i32_0 : i32, i32, i32
  }
  func.func @transform_8(%arg0: i32) -> (i32, i32, i32) {
    %c0_i32 = arith.constant 0 : i32
    %c0_i32_0 = arith.constant 0 : i32
    %c0_i32_1 = arith.constant 0 : i32
    return %arg0, %c0_i32, %c0_i32_0 : i32, i32, i32
  }
}

</mosaic_0001>

<bundles_post_ra>
// kernel: temporal_memory_linkage_step.1
= control target key start
LH: loop header
LB: loop body
LE: loop exit
PB: predicated region body
PF: predicated region fallthrough
CT: control target
= control target key end

     0   :  { %14 = vsyncpa [#allocation3], 0  ;;  %s1304_s0 = inlined_call_operand.vmem [shape: f32[2,1,16], index: 0, kind: input, shape index: {}]   ;;  %s1305_s1 = inlined_call_operand.vmem [shape: f32[2,16,1], index: 1, kind: input, shape index: {}]   ;;  %s1306_s2 = inlined_call_operand.vmem [shape: f32[2,4,16], index: 2, kind: input, shape index: {}]   ;;  %s1307_s3 = inlined_call_operand.vmem [shape: f32[2,16,16], index: 3, kind: input, shape index: {}, may-alias: {3,7}]   ;;  %s1308_s4 = inlined_call_operand.vmem [shape: f32[2,1,16], index: 4, kind: input, shape index: {}, may-alias: {4,8}]   ;;  %s1309_s5 = inlined_call_operand.hbm [shape: f32[2,4,16], index: 5, kind: output, shape index: {0}]   ;;  %s1310_s6 = inlined_call_operand.hbm [shape: f32[2,4,16], index: 6, kind: output, shape index: {1}]   ;;  %s1311_s7 = inlined_call_operand.vmem [shape: f32[2,16,16], index: 7, kind: output, shape index: {2}, may-alias: {3,7}]   ;;  %s1312_s8 = inlined_call_operand.vmem [shape: f32[2,1,16], index: 8, kind: output, shape index: {3}, may-alias: {4,8}]  }
   0x1   :  { %16 = vsyncpa [#allocation3 + $0x1], 0 }
   0x2   :  { %17 = vsyncpa [#allocation5], 0 }
   0x3   :  { %19 = vsyncpa [#allocation5 + $0x1], 0  ;;  %s1128_s27 = smov 0   ;;  %s1130_s28 = smov 0  }
   0x4   :  { %s1132_s29 = smov 0   ;;  %s1134_s30 = smov 0  }
   0x5 LB: > { %s1149_s9 = sadd.s32 4294967295, %s1075_s30   ;;  %s881_s10 = sadd.s32 4294967294, %s1075_s30   ;;  %s1075_s30 = sphi %s1134_s30, %s1320_s30   ;;  %s1071_s29 = sphi %s1132_s29, %s1319_s29   ;;  %s1067_s28 = sphi %s1130_s28, %s1318_s28   ;;  %s1063_s27 = sphi %s1128_s27, %s1317_s27  }
   0x6   : > { %s1153_s11 = sadd.s32 1, %s1075_s30   ;;  %s162_s12 = sadd.s32 1, %s1071_s29 }
   0x7   : > { %s159_s13 = ssub.s32 %s1075_s30, %s1153_s11  ;;  %p172_p0 = scmp.ne.s32.totalorder %s1071_s29, %s1067_s28 }
   0x8   : > { %p160_p1 = scmp.eq.s32.totalorder %s159_s13, 0  ;;  %p173_p2 = scmp.eq.s32.totalorder %s1149_s9, 1 }
   0x9   : > { %p178_p3 = scmp.ne.s32.totalorder %s1067_s28, %s1063_s27  ;;  %p179_p4 = scmp.eq.s32.totalorder %s881_s10, 1 }
   0xa   : > { %s1164_s14 = scalar_select %p160_p1, %s1071_s29, %s162_s12  }
   0xb   : > { %p1166_p5 = por %p173_p2, %p172_p0  ;;  %p1170_p6 = por %p179_p4, %p178_p3 }
   0xc   : > { %p884_p7 = scmp.ge.s32.totalorder %s1075_s30, 1  ;;  %p310_p8 = scmp.lt.s32.totalorder %s1075_s30, 3 }
   0xe   : > { %p311_p9 = pnand %p884_p7, %p310_p8 }
   0xf   : > { %p372_p10 = scmp.lt.s32.totalorder (!%p311_p9), %s1149_s9, 1  ;;  %v1077_v0 = vmov (!%p311_p9), 0   ;;  %vm465_vm0 = vcmask (!%p311_p9), 130048   ;;  %v1078_v6 = vmov (!%p311_p9), 0.0|0.0   ;;  %vm1079_vm1 = vmmov (!%p311_p9), 0   ;;  %s1221_s13 = sand.u32 (!%p311_p9), 1, %s1067_s28  }
  0x10   : > { %314 = sbr.rel (%p311_p9) target bundleno = 525 (0x20d), region = 40  ;;  %980 = vset.pattern.permute.xlu1 (!%p311_p9), %v1077_v0  ;;  %979 = vset.pattern.permute.xlu0 (!%p311_p9), %v1077_v0  ;;  %v1080_v7 = vmov (!%p311_p9), 0.0   ;;  %vm458_vm2 = vcmask (!%p311_p9), 122880   ;;  %v407_v10 = vlaneseq (!%p311_p9)  ;;  %s885_s19 = sshll.u32 (!%p311_p9), %s1221_s13, 2  ;;  %vm652_vm6 = vcmask (!%p311_p9), 125952  }
  0x11   : > { %927 = vmatprep.subr.bf16.mxu1 (!%p311_p9), %v1078_v6  ;;  %924 = vmatprep.mubr.msk.f32.mxu1 (!%p311_p9), %vm1079_vm1, %v1080_v7 }
  0x12   : > { %v408_v11 = vshrl.u32 (!%p311_p9), %v407_v10, 7  ;;  %v411_v19 = vand.u32 (!%p311_p9), 127, %v407_v10 }
  0x14   : > { %v429_v12 = vsub.s32 (!%p311_p9), 0, %v408_v11  ;;  %v409_v23 = vadd.s32 (!%p311_p9), 8, %v408_v11  ;;  %vm412_vm3 = vcmp.ne.s32.totalorder (!%p311_p9), %v408_v11, %v411_v19 }
  0x16   : > { %vm413_vm4 = vcmp.ne.s32.totalorder (!%p311_p9), %v409_v23, %v411_v19 }
  0x17   : > { %s1178_s17 = scalar_select %p372_p10, %s1149_s9, 1  ;;  %vm929_vm5 = vmpackc.low %vm413_vm4, %vm412_vm3 }
  0x19   : > { %s1181_s18 = sshll.u32 %s1178_s17, 4  ;;  %s889_s22 = sshll.u32 %s1178_s17, 2 }
  0x1a   : > { %s379_s21 = scalar_lea.vmem %s1305_s1, %s1181_s18  ;;  %s383_s25 = scalar_lea.vmem %s1306_s2, %s889_s22 }
  0x1b   : > { %v401_v1 = vld [vmem:[%s379_s21] sm:$0xff]  ;;  %v402_v2 = vld [vmem:[%s379_s21 + $0x8] sm:$0xff]  ;;  %s374_s12 = scalar_lea.vmem %s1304_s0, %s1178_s17  ;;  %s391_s20 = scalar_lea.vmem %s1308_s4, %s1178_s17 }
  0x1c   : > { %438 = vperm.xlu1 %980, %v401_v1   ;;  %v414_v3 = vsub.f32 1.0, %v401_v1  ;;  %v415_v4 = vsub.f32 1.0, %v402_v2  ;;  %v403_v5 = vld [vmem:[%s383_s25] sm:$0xf]  ;;  %s388_s23 = scalar_lea.vmem %s1307_s3, %s1181_s18  ;;  %s396_s26 = scalar_lea.vmem %s1311_s7, %s1181_s18 }
  0x1d   : > { %915 = vmatprep.subr.msk.mxu0 %vm465_vm0, %v403_v5  ;;  %v400_v8 = vld [vmem:[%s374_s12] sm:$0x1]  ;;  %v405_v25 = vld [vmem:[%s388_s23 + $0x8] sm:$0xff]  ;;  %s399_s12 = scalar_lea.vmem %s1312_s8, %s1178_s17  ;;  %s359_s21 = scalar_lea.vmem [#allocation4], %s885_s19 }
  0x1e   : > { %418 = vperm.xlu0 %979, %v414_v3   ;;  %916 = vmatpush3.xpose.msk.msra.mxu0 %vm465_vm0, %v403_v5  ;;  %v459_v9 = vsel %vm458_vm2, %v400_v8, 0.0  ;;  %v406_v13 = vld [vmem:[%s391_s20] sm:$0x1]  ;;  %v430_v15 = vrot.slane %v400_v8, %v429_v12  ;;  %s1313_s20 = sshll.u32 %s1149_s9, 6  ;;  %s698_s24 = sshll.u32 %s359_s21, 4  ;;  %s699_s24 = int_to_ptr.vmem [resolvable:$true] %s698_s24 }
  0x1f   : > { %v450_v14 = vrot.slane %v406_v13, %v429_v12  ;;  %v404_v17 = vld [vmem:[%s388_s23] sm:$0xff]  ;;  %s1233_s23 = scalar_lea.hbm %s1310_s6, %s1313_s20  ;;  %s664_s25 = scalar_lea.sflag [#allocation5], %s1221_s13 }
  0x20   : > { %443 = vperm.xlu1 %980, %v402_v2   ;;  %s1081_s18 = smov [#allocation4]  }
  0x21   : > { %s985_s10 = sshll.u32 %s1081_s18, 4  ;;  %s986_s10 = int_to_ptr.vmem [resolvable:$false] %s985_s10 }
  0x22   : > { %423 = vperm.xlu0 %979, %v415_v4   ;;  %p988_p0 = scmp.lt.s32.totalorder %s699_s24, %s986_s10 }
  0x41   : > { %460 = vadd.xlane.f32.xlu0 %v459_v9 }
  0x9b   : > { %v439_v16 = vpop.permute.xlu1 %438 }
  0x9c   : > { %v452_v20 = vmul.f32 %v450_v14, %v439_v16 }
  0x9d   : > { %v419_v18 = vpop.permute.xlu0 %418 }
  0x9e   : > { %v432_v21 = vsub.f32 %v419_v18, %v430_v15 }
  0x9f   : > { %v444_v24 = vpop.permute.xlu1 %443 }
  0xa0   : > { %v434_v22 = vmul.f32 %v432_v21, %v404_v17  ;;  %v453_v29 = vmul.f32 %v450_v14, %v444_v24 }
  0xa1   : > { %v424_v26 = vpop.permute.xlu0 %423 }
  0xa2   : > { %v433_v27 = vsub.f32 %v424_v26, %v430_v15  ;;  %v454_v28 = vadd.f32 %v452_v20, %v434_v22 }
  0xa4   : > { %v435_v30 = vmul.f32 %v433_v27, %v405_v25  ;;  %v456_v31 = vsel %vm412_vm3, %v454_v28, 0.0 }
  0xa5   : > { %917 = vmatprep.mubr.msk.f32.mxu0 %vm465_vm0, %v456_v31  ;;  %655 = vst.msk [vmem:[%s396_s26] sm:$0xff] %vm465_vm0, %v456_v31 }
  0xa6   : > { %v455_v32 = vadd.f32 %v453_v29, %v435_v30 }
  0xa8   : > { %v457_v33 = vsel %vm413_vm4, %v455_v32, 0.0  ;;  %v928_v34 = vpack.c.bf16 %v455_v32, %v454_v28 }
  0xa9   : > { %918 = vmatmul.mubr.msk.f32.vlgmr.msra.gmra.mrb[0].mxu0 %vm465_vm0, %v457_v33  ;;  %656 = vst.msk [vmem:[%s396_s26 + $0x8] sm:$0xff] %vm465_vm0, %v457_v33  ;;  %s981_s26 = scalar_lea.vmem %s699_s24, 64 }
  0xaa   : > { %930 = vmatpush3.bf16.msk.msra.mxu1 %vm929_vm5, %v928_v34  ;;  %p982_p11 = scmp.ne.s32.totalorder %s699_s24, %s981_s26 }
  0xac   : > { %p983_p12 = pnand %p982_p11, %p1166_p5 }
  0xad   : > { %925 = vmatmul.mubr.msk.f32.vlgmr.msra.gmra.mrb[0].mxu1 %vm465_vm0, %v403_v5 }
  0xae   : > { %p984_p13 = pneg %p983_p12 }
  0xce   : > { %v461_v35 = vpop.xlane.xlu0 %460 }
  0xcf   : > { %v462_v36 = vsub.f32 1.0, %v461_v35 }
  0xd1   : > { %v463_v37 = vmul.f32 %v462_v36, %v406_v13 }
  0xd3   : > { %v464_v38 = vadd.f32 %v463_v37, %v400_v8 }
  0xd5   : > { %657 = vst.msk [vmem:[%s399_s12] sm:$0x1] %vm458_vm2, %v464_v38  ;;  %s987_s12 = scalar_lea.vmem %s986_s10, 128 }
  0xd6   : > { %p989_p1 = scmp.lt.s32.totalorder %s987_s12, %s981_s26 }
  0xd8   : > { %p990_p2 = por %p989_p1, %p988_p0 }
  0xda   : > { %p991_p3 = pnand %p990_p2, %p984_p13 }
 0x17c   : > { %v919_v39 = vpop.f32.mrb[0].mxu0 }
 0x17d   : > { %v541_v40 = vpop.f32.mrb[1].mxu0 }
 0x17e   : > { %550 = vxpose.xlu1.b32.start [1/2] (short) (narrow) %v541_v40, 8 }
 0x180   : > { %v648_v41 = vpop.f32.mrb[0].mxu1 }
 0x181   : > { %654 = vst.msk [vmem:[%s359_s21] sm:$0xf] %vm652_vm6, %v648_v41  ;;  %v926_v42 = vpop.f32.mrb[1].mxu1 }
 0x182   : > { %551 = vxpose.xlu1.b32.end [2/2] (short) (narrow) %v919_v39, 8 }
 0x183   : > { %994 = shalt.err (!%p991_p3)
}
 0x184   : > { %s995_s21 = scalar_lea.hbm %s1233_s23, 64  ;;  %s999_s18 = scalar_lea.hbm %s1310_s6, 128 }
 0x185   : > { %p996_p4 = scmp.ne.s32.totalorder %s1233_s23, %s995_s21  ;;  %p1000_p9 = scmp.lt.u32.totalorder %s1233_s23, %s1310_s6 }
 0x186   : > { %p1001_p10 = scmp.lt.u32.totalorder %s999_s18, %s995_s21  ;;  %p1003_p12 = scmp.lt.u32.totalorder %s995_s21, %s1233_s23 }
 0x187   : > { %p997_p7 = pnand %p996_p4, %p1166_p5 }
 0x188   : > { %p1002_p11 = por %p1001_p10, %p1000_p9 }
 0x189   : > { %p998_p8 = pneg %p997_p7 }
 0x18a   : > { %p1004_p13 = por %p1003_p12, %p1002_p11 }
 0x18c   : > { %p1005_p0 = pnand %p1004_p13, %p998_p8 }
 0x18e   : > { %1008 = shalt.err (!%p1005_p0)
}
 0x18f   : > { %932 = dma.vmem_to_hbm [thread:$0]  (%p1166_p5), %s699_s24, 64, %s1233_s23, %s664_s25  }
 0x190   : > { %s352_s26 = scalar_lea.vmem [#allocation2], %s885_s19  ;;  %s1316_s17 = sshll.u32 %s1149_s9, 6 }
 0x191   : > { %s685_s12 = sshll.u32 %s352_s26, 4  ;;  %s1260_s18 = scalar_lea.hbm %s1309_s5, %s1316_s17  ;;  %s1262_s12 = int_to_ptr.vmem [resolvable:$true] %s685_s12 }
 0x192   : > { %s659_s21 = scalar_lea.sflag [#allocation3], %s1221_s13  ;;  %s1009_s10 = scalar_lea.vmem %s1262_s12, 64 }
 0x193   : > { %p1010_p1 = scmp.ne.s32.totalorder %s1262_s12, %s1009_s10  ;;  %s1082_s9 = smov [#allocation2]  }
 0x194   : > { %s1013_s19 = sshll.u32 %s1082_s9, 4  ;;  %s1014_s19 = int_to_ptr.vmem [resolvable:$false] %s1013_s19 }
 0x195   : > { %p1011_p2 = pnand %p1010_p1, %p1166_p5  ;;  %s1015_s23 = scalar_lea.vmem %s1014_s19, 128 }
 0x196   : > { %p1016_p4 = scmp.lt.s32.totalorder %s1262_s12, %s1014_s19  ;;  %p1017_p7 = scmp.lt.s32.totalorder %s1015_s23, %s1009_s10 }
 0x197   : > { %p1012_p3 = pneg %p1011_p2 }
 0x198   : > { %p1018_p8 = por %p1017_p7, %p1016_p4 }
 0x19a   : > { %p1019_p9 = pnand %p1018_p8, %p1012_p3 }
 0x1fe   : > { %v566_v43 = vpop.trf.xlu1 }
 0x1ff   : > { %653 = vst.msk [vmem:[%s352_s26] sm:$0xf] %vm652_vm6, %v566_v43 }
 0x200   : > { %1022 = shalt.err (!%p1019_p9)
}
 0x201   : > { %s1023_s13 = scalar_lea.hbm %s1260_s18, 64  ;;  %s1027_s26 = scalar_lea.hbm %s1309_s5, 128 }
 0x202   : > { %p1024_p10 = scmp.ne.s32.totalorder %s1260_s18, %s1023_s13  ;;  %p1028_p13 = scmp.lt.u32.totalorder %s1260_s18, %s1309_s5 }
 0x203   : > { %p1029_p0 = scmp.lt.u32.totalorder %s1027_s26, %s1023_s13  ;;  %p1031_p2 = scmp.lt.u32.totalorder %s1023_s13, %s1260_s18 }
 0x204   : > { %p1025_p11 = pnand %p1024_p10, %p1166_p5 }
 0x205   : > { %p1030_p1 = por %p1029_p0, %p1028_p13 }
 0x206   : > { %p1026_p12 = pneg %p1025_p11 }
 0x207   : > { %p1032_p3 = por %p1031_p2, %p1030_p1 }
 0x209   : > { %p1033_p4 = pnand %p1032_p3, %p1026_p12 }
 0x20b   : > { %1036 = shalt.err (!%p1033_p4)
}
 0x20c   : > { %931 = dma.vmem_to_hbm [thread:$0]  (%p1166_p5), %s1262_s12, 64, %s1260_s18, %s659_s21  }
 0x20d PF: > { %p942_p7 = scmp.ge.s32.totalorder %s1075_s30, 2  ;;  %s716_s22 = sand.u32 1, %s1063_s27  }
 0x20e   : > { %s717_s10 = scalar_lea.sflag [#allocation3], %s716_s22 }
 0x20f   : > { %p936_p8 = pnand %p942_p7, %p1170_p6 }
 0x211   : > { %1054 = dma.done.wait (!%p936_p8), %s717_s10, 64  }
 0x212   : > { %1056 = vsyncadd (!%p936_p8), %s717_s10, 4294967232  ;;  %s726_s9 = scalar_lea.sflag [#allocation5], %s716_s22 }
 0x213   : > { %1058 = dma.done.wait (!%p936_p8), %s726_s9, 64  }
 0x214   : > { %1060 = vsyncadd (!%p936_p8), %s726_s9, 4294967232  ;;  %p22_p5 = scmp.ge.s32.totalorder %s1153_s11, 4   ;;  %s1317_s27 = smov %s1067_s28 }
 0x215   : > { %s1318_s28 = smov %s1071_s29  ;;  %s1319_s29 = smov %s1164_s14 }
 0x216   : > { %s1320_s30 = smov %s1153_s11  ;;  %24 = sbr.rel (!%p22_p5) target bundleno = 5 (0x5), region = 128 }
 0x21d   :  { %745 = vsyncpa [#allocation3], 1 }
 0x21e   :  { %747 = vsyncpa [#allocation3 + $0x1], 1 }
 0x21f   :  { %748 = vsyncpa [#allocation5], 1 }
 0x220   :  { %750 = vsyncpa [#allocation5 + $0x1], 1 }

</bundles_post_ra>
